<compile_context>
chip_gen: v5e
topology: v5e:2x2
jax: 0.10.0
libtpu: 0.0.40
codegen_flags: <defaults>
</compile_context>

<pallas_src>
import jax
import jax.numpy as jnp
from jax.experimental import pallas as pl
from jax.experimental.pallas import tpu as pltpu


def _round_up(n, m):
    return ((n + m - 1) // m) * m


def _make_mlp_kernel(num_layers):
    """Fused MLP kernel: [Linear -> ReLU] x (L-1) -> Linear -> Tanh.

    Ref layout: (x_ref, w0_ref, b0_ref, w1_ref, b1_ref, ..., out_ref)
      x_ref : (TB, D0_pad)      batch tile of inputs
      wi_ref: (Di_pad, Di+1_pad) weights, already transposed on host (in, out)
      bi_ref: (1, Di+1_pad)      bias row (broadcasts over batch)
      out_ref:(TB, DL_pad)       output tile
    """
    def kernel(*refs):
        x_ref = refs[0]
        out_ref = refs[-1]
        h = x_ref[...].astype(jnp.float32)
        for i in range(num_layers):
            w_ref = refs[1 + 2 * i]
            b_ref = refs[2 + 2 * i]
            # Weights are pre-transposed -> straight MXU matmul, no XLU transpose.
            h = jnp.dot(h, w_ref[...], preferred_element_type=jnp.float32) + b_ref[...]
            if i < num_layers - 1:
                h = jnp.maximum(h, 0.0)   # ReLU between hidden layers
            else:
                h = jnp.tanh(h)           # final Tanh
        out_ref[...] = h.astype(out_ref.dtype)

    return kernel


def dnn_relu_tanh_forward(x, weights, biases):
    """Forward pass of DNN_relu_tanh.

    x:        (B, F) float32
    weights:  list of (out_i, in_i) arrays (torch nn.Linear layout)
    biases:   list of (out_i,) arrays
    Returns:  (B, out_last) float32
    """
    B, F = x.shape
    num_layers = len(weights)
    dims = [F] + [int(w.shape[0]) for w in weights]

    # Pad everything to the (8, 128) vreg tile so every matmul / store is
    # lane-dense and unmasked. Zero padding is exact: relu(0)=0, tanh(0)=0,
    # and zero rows/cols contribute nothing to subsequent matmuls.
    B_pad = _round_up(B, 8)
    dims_pad = [_round_up(d, 128) for d in dims]

    x_p = jnp.zeros((B_pad, dims_pad[0]), jnp.float32).at[:B, :F].set(
        x.astype(jnp.float32))

    args = [x_p]
    # Batch tile: whole (small) padded batch in one grid step, or 128-row tiles.
    TB = B_pad if B_pad <= 128 else 128
    if B_pad % TB != 0:
        TB = B_pad
    grid = (B_pad // TB,)

    in_specs = [pl.BlockSpec((TB, dims_pad[0]), lambda i: (i, 0))]
    for li in range(num_layers):
        d_in, d_out = dims[li], dims[li + 1]
        dp_in, dp_out = dims_pad[li], dims_pad[li + 1]
        # Pre-transpose on the host: kernel sees (in, out) and never transposes.
        w_t = jnp.zeros((dp_in, dp_out), jnp.float32).at[:d_in, :d_out].set(
            weights[li].astype(jnp.float32).T)
        b_row = jnp.zeros((1, dp_out), jnp.float32).at[0, :d_out].set(
            biases[li].astype(jnp.float32))
        args += [w_t, b_row]
        # Weights/biases are VMEM-resident with a constant block index.
        in_specs += [
            pl.BlockSpec((dp_in, dp_out), lambda i: (0, 0)),
            pl.BlockSpec((1, dp_out), lambda i: (0, 0)),
        ]

    out_spec = pl.BlockSpec((TB, dims_pad[-1]), lambda i: (i, 0))

    out_p = pl.pallas_call(
        _make_mlp_kernel(num_layers),
        out_shape=jax.ShapeDtypeStruct((B_pad, dims_pad[-1]), jnp.float32),
        grid=grid,
        in_specs=in_specs,
        out_specs=out_spec,
        compiler_params=pltpu.CompilerParams(
            # batch tiles are independent -> parallel (megacore-shardable)
            dimension_semantics=("parallel",),
            vmem_limit_bytes=64 << 20,
        ),
    )(*args)

    return out_p[:B, : dims[-1]]


def dnn_relu_tanh_reference(x, weights, biases):
    """Pure-JAX reference replicating the torch module's forward (eval mode)."""
    h = x.astype(jnp.float32)
    n = len(weights)
    for i, (w, b) in enumerate(zip(weights, biases)):
        h = h @ w.T + b
        if i < n - 1:
            h = jnp.maximum(h, 0.0)
    return jnp.tanh(h)


if __name__ == "__main__":
    # Small shapes consistent with the module:
    # feature_size=16, hidden_layer=[32, 32], dropout=[0.0], batch=2
    B, F = 2, 16
    hidden_layer = [32, 32]

    key = jax.random.PRNGKey(0)
    kx, *wkeys = jax.random.split(key, 1 + 2 * len(hidden_layer))

    x = jax.random.normal(kx, (B, F), dtype=jnp.float32)

    dims = [F] + hidden_layer
    weights, biases = [], []
    for li in range(len(hidden_layer)):
        fan_in = dims[li]
        bound = 1.0 / jnp.sqrt(jnp.float32(fan_in))
        kw, kb = jax.random.split(wkeys[li])
        weights.append(jax.random.uniform(
            kw, (dims[li + 1], dims[li]), minval=-bound, maxval=bound,
            dtype=jnp.float32))
        biases.append(jax.random.uniform(
            kb, (dims[li + 1],), minval=-bound, maxval=bound, dtype=jnp.float32))

    out = dnn_relu_tanh_forward(x, weights, biases)
    out = jax.block_until_ready(out)

    ref = dnn_relu_tanh_reference(x, weights, biases)
    assert out.shape == (B, hidden_layer[-1]), out.shape
    assert jnp.allclose(out, ref, atol=1e-5, rtol=1e-5), "mismatch vs reference"

    print("KERNEL_OK")
</pallas_src>

<mosaic_0001>
module attributes {stable_mosaic.version = 11 : i64} {
  func.func @kernel(%arg0: i32, %arg1: memref<8x128xf32, #tpu.memory_space<vmem>>, %arg2: memref<128x128xf32, #tpu.memory_space<vmem>>, %arg3: memref<1x128xf32, #tpu.memory_space<vmem>>, %arg4: memref<128x128xf32, #tpu.memory_space<vmem>>, %arg5: memref<1x128xf32, #tpu.memory_space<vmem>>, %arg6: memref<8x128xf32, #tpu.memory_space<vmem>>) attributes {dimension_semantics = [#tpu.dimension_semantics<parallel>], iteration_bounds = array<i64: 1>, scalar_prefetch = 0 : i64, scratch_operands = 0 : i64, tpu.core_type = #tpu.core_type<tc>, window_params = [{transform_indices = @transform_0, window_bounds = array<i64: 8, 128>}, {pipeline_mode = #tpu.pipeline_mode<synchronous>, transform_indices = @transform_1, window_bounds = array<i64: 128, 128>}, {pipeline_mode = #tpu.pipeline_mode<synchronous>, transform_indices = @transform_2, window_bounds = array<i64: 1, 128>}, {pipeline_mode = #tpu.pipeline_mode<synchronous>, transform_indices = @transform_3, window_bounds = array<i64: 128, 128>}, {pipeline_mode = #tpu.pipeline_mode<synchronous>, transform_indices = @transform_4, window_bounds = array<i64: 1, 128>}, {transform_indices = @transform_5, window_bounds = array<i64: 8, 128>}]} {
    %c0 = arith.constant 0 : index
    %c0_0 = arith.constant 0 : index
    %0 = vector.load %arg1[%c0, %c0_0] : memref<8x128xf32, #tpu.memory_space<vmem>>, vector<8x128xf32>
    %c0_1 = arith.constant 0 : index
    %c0_2 = arith.constant 0 : index
    %1 = vector.load %arg2[%c0_1, %c0_2] : memref<128x128xf32, #tpu.memory_space<vmem>>, vector<128x128xf32>
    %cst = arith.constant dense<0.000000e+00> : vector<8x128xf32>
    %2 = tpu.matmul %0, %1, %cst {dimension_numbers = #tpu.dot_dimension_numbers<[1], [0], [0], [1], [0, 0, 1, 1], [], []>} : vector<8x128xf32>, vector<128x128xf32>, vector<8x128xf32> -> vector<8x128xf32>
    %c0_3 = arith.constant 0 : index
    %c0_4 = arith.constant 0 : index
    %3 = vector.load %arg3[%c0_3, %c0_4] : memref<1x128xf32, #tpu.memory_space<vmem>>, vector<1x128xf32>
    %4 = vector.broadcast %3 : vector<1x128xf32> to vector<8x128xf32>
    %5 = arith.addf %2, %4 : vector<8x128xf32>
    %cst_5 = arith.constant 0.000000e+00 : f32
    %6 = vector.broadcast %cst_5 : f32 to vector<8x128xf32>
    %7 = arith.maximumf %5, %6 : vector<8x128xf32>
    %c0_6 = arith.constant 0 : index
    %c0_7 = arith.constant 0 : index
    %8 = vector.load %arg4[%c0_6, %c0_7] : memref<128x128xf32, #tpu.memory_space<vmem>>, vector<128x128xf32>
    %cst_8 = arith.constant dense<0.000000e+00> : vector<8x128xf32>
    %9 = tpu.matmul %7, %8, %cst_8 {dimension_numbers = #tpu.dot_dimension_numbers<[1], [0], [0], [1], [0, 0, 1, 1], [], []>} : vector<8x128xf32>, vector<128x128xf32>, vector<8x128xf32> -> vector<8x128xf32>
    %c0_9 = arith.constant 0 : index
    %c0_10 = arith.constant 0 : index
    %10 = vector.load %arg5[%c0_9, %c0_10] : memref<1x128xf32, #tpu.memory_space<vmem>>, vector<1x128xf32>
    %11 = vector.broadcast %10 : vector<1x128xf32> to vector<8x128xf32>
    %12 = arith.addf %9, %11 : vector<8x128xf32>
    %13 = math.tanh %12 : vector<8x128xf32>
    %c0_11 = arith.constant 0 : index
    %c0_12 = arith.constant 0 : index
    %14 = vector.load %arg6[%c0_11, %c0_12] : memref<8x128xf32, #tpu.memory_space<vmem>>, vector<8x128xf32>
    tpu.vector_store %arg6[%c0_11, %c0_12], %13 {strides = array<i32>} : memref<8x128xf32, #tpu.memory_space<vmem>>, vector<8x128xf32>,
    return
  }
  func.func @transform_0(%arg0: i32) -> (i32, i32) {
    %c0_i32 = arith.constant 0 : i32
    %c0_i32_0 = arith.constant 0 : i32
    return %arg0, %c0_i32 : i32, i32
  }
  func.func @transform_1(%arg0: i32) -> (i32, i32) {
    %c0_i32 = arith.constant 0 : i32
    %c0_i32_0 = arith.constant 0 : i32
    %c0_i32_1 = arith.constant 0 : i32
    return %c0_i32, %c0_i32_0 : i32, i32
  }
  func.func @transform_2(%arg0: i32) -> (i32, i32) {
    %c0_i32 = arith.constant 0 : i32
    %c0_i32_0 = arith.constant 0 : i32
    %c0_i32_1 = arith.constant 0 : i32
    return %c0_i32, %c0_i32_0 : i32, i32
  }
  func.func @transform_3(%arg0: i32) -> (i32, i32) {
    %c0_i32 = arith.constant 0 : i32
    %c0_i32_0 = arith.constant 0 : i32
    %c0_i32_1 = arith.constant 0 : i32
    return %c0_i32, %c0_i32_0 : i32, i32
  }
  func.func @transform_4(%arg0: i32) -> (i32, i32) {
    %c0_i32 = arith.constant 0 : i32
    %c0_i32_0 = arith.constant 0 : i32
    %c0_i32_1 = arith.constant 0 : i32
    return %c0_i32, %c0_i32_0 : i32, i32
  }
  func.func @transform_5(%arg0: i32) -> (i32, i32) {
    %c0_i32 = arith.constant 0 : i32
    %c0_i32_0 = arith.constant 0 : i32
    return %arg0, %c0_i32 : i32, i32
  }
}

</mosaic_0001>

<bundles_post_ra>
// kernel: tpu_custom_call.1
= control target key start
LH: loop header
LB: loop body
LE: loop exit
PB: predicated region body
PF: predicated region fallthrough
CT: control target
= control target key end

     0   :  { %10 = vsyncpa [#allocation3], 0  ;;  %s334_s0 = inlined_call_operand.hbm [shape: f32[8,128], index: 0, kind: input, shape index: {}]   ;;  %s335_s1 = inlined_call_operand.hbm [shape: f32[128,128], index: 1, kind: input, shape index: {}]   ;;  %s336_s2 = inlined_call_operand.vmem [shape: f32[1,128], index: 2, kind: input, shape index: {}]   ;;  %s337_s3 = inlined_call_operand.hbm [shape: f32[128,128], index: 3, kind: input, shape index: {}]   ;;  %s338_s4 = inlined_call_operand.vmem [shape: f32[1,128], index: 4, kind: input, shape index: {}]   ;;  %s339_s5 = inlined_call_operand.hbm [shape: f32[8,128], index: 5, kind: output, shape index: {}]  }
   0x1   :  { %11 = vsyncpa [#allocation6], 0  ;;  %s28_s20 = sshll.u32 %s335_s1, 4  ;;  %s29_s20 = int_to_ptr.hbm [resolvable:$true] %s28_s20 }
   0x2   :  { %12 = vsyncpa [#allocation4], 0  ;;  %s280_s21 = smov [#allocation5]   ;;  %s18_s25 = sshll.u32 %s334_s0, 4  ;;  %s19_s25 = int_to_ptr.hbm [resolvable:$true] %s18_s25 }
   0x3   :  { %s30_s22 = sshll.u32 %s280_s21, 4  ;;  %s281_s26 = smov 128   ;;  %s31_s22 = int_to_ptr.vmem [resolvable:$true] %s30_s22 }
   0x4   :  { %s282_s27 = smov 8   ;;  %s283_s28 = smov [#allocation2]  }
   0x5   :  { %36 = dma.hbm_to_vmem [thread:$0]  %s29_s20, 2048, %s31_s22, [#allocation6], %s281_s26, %s281_s26, %s282_s27  }
   0x6   :  { %s20_s29 = sshll.u32 %s283_s28, 4  ;;  %s43_s7 = sshll.u32 %s337_s3, 4  ;;  %s21_s29 = int_to_ptr.vmem [resolvable:$true] %s20_s29  ;;  %s44_s7 = int_to_ptr.hbm [resolvable:$true] %s43_s7 }
   0x7   :  { %23 = dma.hbm_to_vmem [thread:$0]  %s19_s25, 128, %s21_s29, [#allocation3]  }
   0x8   :  { %s284_s1 = smov [#allocation7]  }
   0x9   :  { %s45_s8 = sshll.u32 %s284_s1, 4  ;;  %s46_s8 = int_to_ptr.vmem [resolvable:$true] %s45_s8 }
   0xa   :  { %51 = dma.hbm_to_vmem [thread:$0]  %s44_s7, 2048, %s46_s8, [#allocation6], %s281_s26, %s281_s26, %s282_s27  }
   0xb   :  { %274 = dma.done.wait [#allocation3], 128  }
   0xc   :  { %275 = vsyncadd [#allocation3], 4294967168 }
   0xd   :  { %276 = dma.done.wait [#allocation6], 4096  }
   0xe   :  { %277 = vsyncadd [#allocation6], 4294963200  ;;  %v82_v0 = vld [vmem:[#allocation5 + $0x78] sm:$0xff]  ;;  %v81_v1 = vld [vmem:[#allocation5 + $0x70] sm:$0xff]  ;;  %s285_s11 = smov [#allocation8]   ;;  %s157_s15 = sshll.u32 %s339_s5, 4  ;;  %s158_s15 = int_to_ptr.hbm [resolvable:$true] %s157_s15 }
   0xf   :  { %87 = vmatpush.msra.mxu0 %v82_v0  ;;  %v80_v2 = vld [vmem:[#allocation5 + $0x68] sm:$0xff]  ;;  %v79_v3 = vld [vmem:[#allocation5 + $0x60] sm:$0xff]  ;;  %v123_v4 = vld [vmem:[#allocation7 + $0x78] sm:$0xff]  ;;  %s155_s12 = sshll.u32 %s285_s11, 4  ;;  %s156_s12 = int_to_ptr.vmem [resolvable:$true] %s155_s12 }
  0x10   :  { %v78_v5 = vld [vmem:[#allocation5 + $0x58] sm:$0xff]  ;;  %128 = vmatpush.msra.mxu1 %v123_v4  ;;  %v122_v6 = vld [vmem:[#allocation7 + $0x70] sm:$0xff]  ;;  %v121_v7 = vld [vmem:[#allocation7 + $0x68] sm:$0xff] }
  0x11   :  { %88 = vmatpush.msra.mxu0 %v81_v1  ;;  %v77_v8 = vld [vmem:[#allocation5 + $0x50] sm:$0xff]  ;;  %v120_v9 = vld [vmem:[#allocation7 + $0x60] sm:$0xff]  ;;  %v76_v10 = vld [vmem:[#allocation5 + $0x48] sm:$0xff] }
  0x12   :  { %129 = vmatpush.msra.mxu1 %v122_v6  ;;  %v119_v11 = vld [vmem:[#allocation7 + $0x58] sm:$0xff]  ;;  %v75_v12 = vld [vmem:[#allocation5 + $0x40] sm:$0xff]  ;;  %v118_v13 = vld [vmem:[#allocation7 + $0x50] sm:$0xff] }
  0x13   :  { %89 = vmatpush.msra.mxu0 %v80_v2  ;;  %v74_v14 = vld [vmem:[#allocation5 + $0x38] sm:$0xff]  ;;  %v117_v15 = vld [vmem:[#allocation7 + $0x48] sm:$0xff]  ;;  %v73_v16 = vld [vmem:[#allocation5 + $0x30] sm:$0xff] }
  0x14   :  { %130 = vmatpush.msra.mxu1 %v121_v7  ;;  %v116_v17 = vld [vmem:[#allocation7 + $0x40] sm:$0xff]  ;;  %v72_v18 = vld [vmem:[#allocation5 + $0x28] sm:$0xff]  ;;  %v115_v19 = vld [vmem:[#allocation7 + $0x38] sm:$0xff] }
  0x15   :  { %90 = vmatpush.msra.mxu0 %v79_v3  ;;  %v71_v20 = vld [vmem:[#allocation5 + $0x20] sm:$0xff]  ;;  %v114_v21 = vld [vmem:[#allocation7 + $0x30] sm:$0xff]  ;;  %v70_v22 = vld [vmem:[#allocation5 + $0x18] sm:$0xff] }
  0x16   :  { %131 = vmatpush.msra.mxu1 %v120_v9  ;;  %v113_v23 = vld [vmem:[#allocation7 + $0x28] sm:$0xff]  ;;  %v69_v24 = vld [vmem:[#allocation5 + $0x10] sm:$0xff]  ;;  %v112_v25 = vld [vmem:[#allocation7 + $0x20] sm:$0xff] }
  0x17   :  { %91 = vmatpush.msra.mxu0 %v78_v5  ;;  %v68_v26 = vld [vmem:[#allocation5 + $0x8] sm:$0xff]  ;;  %v111_v27 = vld [vmem:[#allocation7 + $0x18] sm:$0xff]  ;;  %v67_v28 = vld [vmem:[#allocation5] sm:$0xff] }
  0x18   :  { %132 = vmatpush.msra.mxu1 %v119_v11  ;;  %v66_v29 = vld [vmem:[#allocation2] sm:$0xff]  ;;  %v110_v30 = vld [vmem:[#allocation7 + $0x10] sm:$0xff]  ;;  %v109_v31 = vld [vmem:[#allocation7 + $0x8] sm:$0xff] }
  0x19   :  { %92 = vmatpush.msra.mxu0 %v77_v8  ;;  %v108_v32 = vld [vmem:[#allocation7] sm:$0xff]  ;;  %v174_v33 = vld [vmem:[%s336_s2] ss:$0 sm:$0xff] }
  0x1a   :  { %133 = vmatpush.msra.mxu1 %v118_v13  ;;  %v175_v37 = vld [vmem:[%s338_s4] ss:$0 sm:$0xff] }
  0x1b   :  { %93 = vmatpush.msra.mxu0 %v76_v10 }
  0x1c   :  { %134 = vmatpush.msra.mxu1 %v117_v15 }
  0x1d   :  { %94 = vmatpush.msra.mxu0 %v75_v12 }
  0x1e   :  { %135 = vmatpush.msra.mxu1 %v116_v17 }
  0x1f   :  { %95 = vmatpush.msra.mxu0 %v74_v14 }
  0x20   :  { %136 = vmatpush.msra.mxu1 %v115_v19 }
  0x21   :  { %96 = vmatpush.msra.mxu0 %v73_v16 }
  0x22   :  { %137 = vmatpush.msra.mxu1 %v114_v21 }
  0x23   :  { %97 = vmatpush.msra.mxu0 %v72_v18 }
  0x24   :  { %138 = vmatpush.msra.mxu1 %v113_v23 }
  0x25   :  { %98 = vmatpush.msra.mxu0 %v71_v20 }
  0x26   :  { %139 = vmatpush.msra.mxu1 %v112_v25 }
  0x27   :  { %99 = vmatpush.msra.mxu0 %v70_v22 }
  0x28   :  { %140 = vmatpush.msra.mxu1 %v111_v27 }
  0x29   :  { %100 = vmatpush.msra.mxu0 %v69_v24 }
  0x2a   :  { %141 = vmatpush.msra.mxu1 %v110_v30 }
  0x2b   :  { %101 = vmatpush.msra.mxu0 %v68_v26 }
  0x2c   :  { %142 = vmatpush.msra.mxu1 %v109_v31 }
  0x2d   :  { %102 = vmatpush.msra.mxu0 %v67_v28 }
  0x2e   :  { %103 = vmatmul.f32.vlgmr.msra.gmra.mxu0 %v66_v29  ;;  %143 = vmatpush.msra.mxu1 %v108_v32 }
  0xab   :  { %v104_v34 = vpop.f32.mrf.mxu0 }
  0xac   :  { %v105_v35 = vadd.f32 %v174_v33, %v104_v34 }
  0xae   :  { %v107_v36 = vmax.f32 %v105_v35, 0.0 }
  0xb0   :  { %144 = vmatmul.f32.vlgmr.msra.gmra.mxu1 %v107_v36 }
 0x12d   :  { %v145_v38 = vpop.f32.mrf.mxu1 }
 0x12e   :  { %v146_v39 = vadd.f32 %v175_v37, %v145_v38 }
 0x130   :  { %176 = vtanh.f32 %v146_v39 }
 0x136   :  { %v177_v40 = vpop.eup %176 }
 0x137   :  { %149 = vst [vmem:[#allocation8] sm:$0xff] %v177_v40 }
 0x138   :  { %160 = dma.vmem_to_hbm [thread:$0]  %s156_s12, 128, %s158_s15, [#allocation4]  }
 0x139   :  { %278 = dma.done.wait [#allocation4], 128  }
 0x13a   :  { %279 = vsyncadd [#allocation4], 4294967168 }
 0x13b   :  { %165 = vsyncpa [#allocation3], 1 }
 0x13c   :  { %166 = vsyncpa [#allocation6], 1 }
 0x13d   :  { %167 = vsyncpa [#allocation4], 1 }

</bundles_post_ra>
